<compile_context>
chip_gen: v7x
topology: tpu7x:2x2x1
jax: 0.10.0
libtpu: 0.0.40
codegen_flags: <defaults>
</compile_context>

<pallas_src>
import functools
import math

import jax
import jax.numpy as jnp
from jax.experimental import pallas as pl
from jax.experimental.pallas import tpu as pltpu


# ---------------------------------------------------------------------------
# Kernel 1: MQA-shared K / V projections (done once, reused by every q-block
# and every head).
# ---------------------------------------------------------------------------
def _kv_project_kernel(k_ref, v_ref, wk_ref, wv_ref, kp_ref, vp_ref):
    """k_ref/v_ref: (1, block_k, d_model); wk/wv: (d_model, d_{k,v})."""
    kp_ref[0] = jnp.dot(k_ref[0], wk_ref[...],
                        preferred_element_type=jnp.float32).astype(kp_ref.dtype)
    vp_ref[0] = jnp.dot(v_ref[0], wv_ref[...],
                        preferred_element_type=jnp.float32).astype(vp_ref.dtype)


def _project_kv(K, V, wk, wv, *, block_k):
    B, Lk, d_model = K.shape
    d_k = wk.shape[-1]
    d_v = wv.shape[-1]
    nk = Lk // block_k
    return pl.pallas_call(
        _kv_project_kernel,
        out_shape=(jax.ShapeDtypeStruct((B, Lk, d_k), K.dtype),
                   jax.ShapeDtypeStruct((B, Lk, d_v), V.dtype)),
        grid_spec=pltpu.PrefetchScalarGridSpec(
            num_scalar_prefetch=0,
            grid=(B, nk),
            in_specs=[
                pl.BlockSpec((1, block_k, d_model), lambda b, ki: (b, ki, 0)),
                pl.BlockSpec((1, block_k, d_model), lambda b, ki: (b, ki, 0)),
                pl.BlockSpec((d_model, d_k), lambda b, ki: (0, 0)),
                pl.BlockSpec((d_model, d_v), lambda b, ki: (0, 0)),
            ],
            out_specs=[
                pl.BlockSpec((1, block_k, d_k), lambda b, ki: (b, ki, 0)),
                pl.BlockSpec((1, block_k, d_v), lambda b, ki: (b, ki, 0)),
            ],
        ),
        compiler_params=pltpu.CompilerParams(
            dimension_semantics=("parallel", "parallel"),
            vmem_limit_bytes=32 * 1024 * 1024,
        ),
    )(K, V, wk, wv)


# ---------------------------------------------------------------------------
# Kernel 2: flash-style multi-query attention over pre-projected K / V.
# ---------------------------------------------------------------------------
def _mqa_flash_kernel(q_ref, kp_ref, vp_ref, pad_ref, wq_ref, wo_ref,
                      o_ref,
                      qh_ref, m_ref, l_ref, acc_ref,
                      *, num_heads, causal):
    """One (batch, q-block, k-block) tile per grid step.

    q_ref:    (1, block_q, d_model)  raw queries
    kp_ref:   (1, block_k, d_k)      projected keys (shared across heads)
    vp_ref:   (1, block_k, d_v)      projected values (shared across heads)
    pad_ref:  (1, 1, block_k)        int32 key-padding mask (0 == masked out)
    wq_ref:   (d_model, H*d_k)
    wo_ref:   (H*d_v, d_model)
    o_ref:    (1, block_q, d_model)
    qh_ref:   (H, block_q, d_k)      scratch: per-head scaled Q projection
    m_ref:    (H, block_q, 1)        scratch: running max
    l_ref:    (H, block_q, 1)        scratch: running sum
    acc_ref:  (H, block_q, d_v)      scratch: running weighted V
    """
    qi = pl.program_id(1)
    ki = pl.program_id(2)
    nk = pl.num_programs(2)

    block_q = q_ref.shape[1]
    block_k = kp_ref.shape[1]
    d_k = kp_ref.shape[-1]
    scale = 1.0 / math.sqrt(d_k)

    @pl.when(ki == 0)
    def _init():
        m_ref[...] = jnp.full(m_ref.shape, -jnp.inf, dtype=jnp.float32)
        l_ref[...] = jnp.zeros(l_ref.shape, dtype=jnp.float32)
        acc_ref[...] = jnp.zeros(acc_ref.shape, dtype=jnp.float32)
        # Q projection hoisted out of the k loop; scale folded in once.
        q_all = jnp.dot(q_ref[0], wq_ref[...],
                        preferred_element_type=jnp.float32) * scale
        # Per-head lane slices carved out once so the k loop never lane-slices.
        for h in range(num_heads):
            qh_ref[h] = q_all[:, h * d_k:(h + 1) * d_k]

    def _accumulate():
        k_p = kp_ref[0]                                                  # (bk, d_k)
        v_p = vp_ref[0]                                                  # (bk, d_v)

        # Mask for this tile, computed in-kernel (no (Lq, Lk) HBM mask traffic).
        keep = pad_ref[0] != 0                                           # (1, bk)
        if causal:
            q_pos = qi * block_q + jax.lax.broadcasted_iota(
                jnp.int32, (block_q, block_k), 0)
            k_pos = ki * block_k + jax.lax.broadcasted_iota(
                jnp.int32, (block_q, block_k), 1)
            keep = jnp.logical_and(keep, k_pos <= q_pos)                 # (bq, bk)

        for h in range(num_heads):  # static unroll; per-head scores die in-iteration
            q_h = qh_ref[h]                                              # (bq, d_k)
            # Contract last dims of both operands (no explicit k_p.T copy).
            s = jax.lax.dot_general(q_h, k_p, (((1,), (1,)), ((), ())),
                                    preferred_element_type=jnp.float32)  # (bq, bk)
            s = jnp.where(keep, s, jnp.float32(-1e9))

            m_prev = m_ref[h]                                            # (bq, 1)
            m_new = jnp.maximum(m_prev, jnp.max(s, axis=-1, keepdims=True))
            alpha = jnp.exp(m_prev - m_new)
            p = jnp.exp(s - m_new)
            l_ref[h] = alpha * l_ref[h] + jnp.sum(p, axis=-1, keepdims=True)
            acc_ref[h] = alpha * acc_ref[h] + jnp.dot(
                p, v_p, preferred_element_type=jnp.float32)
            m_ref[h] = m_new

    if causal:
        # Skip key blocks that lie entirely above the diagonal (their masked
        # contribution would be exactly zero anyway).
        @pl.when(ki * block_k <= qi * block_q + (block_q - 1))
        def _():
            _accumulate()
    else:
        _accumulate()

    @pl.when(ki == nk - 1)
    def _finalize():
        # Normalize each head (EUP reciprocal, not a VPU divide) and build the
        # lane-dense (block_q, H*d_v) operand for a single W_o matmul.
        outs = [acc_ref[h] * pl.reciprocal(l_ref[h], approx=False)
                for h in range(num_heads)]
        cat = jnp.concatenate(outs, axis=-1)                             # (bq, H*d_v)
        out = jnp.dot(cat, wo_ref[...], preferred_element_type=jnp.float32)
        o_ref[0] = out.astype(o_ref.dtype)


def _pick_block(n, target, lane_multiple):
    """Largest divisor of n that is <= target and a multiple of lane_multiple."""
    if n <= target:
        return n
    for b in range(target, 0, -1):
        if n % b == 0 and b % lane_multiple == 0:
            return b
    return n  # fall back: no tiling along this axis


def multi_query_attention(Q, K, V, params, *, num_heads, d_k, d_v, causal,
                          pad_attn_mask=None,
                          block_q_target=256, block_k_target=512):
    """JAX wrapper matching MultiQueryAttention.forward semantics."""
    B, Lq, d_model = Q.shape
    Lk = K.shape[1]
    assert K.shape[1] == V.shape[1], "len_k and len_v must be equal"

    # Weights pre-transposed to (in, out) so the kernels do x @ W.
    wq = params["wq"]   # (d_model, H*d_k)
    wk = params["wk"]   # (d_model, d_k)
    wv = params["wv"]   # (d_model, d_v)
    wo = params["wo"]   # (H*d_v, d_model)

    # Compact (B, 1, Lk) key-padding mask; the causal mask is built in-kernel.
    if pad_attn_mask is None:
        pad = jnp.ones((B, 1, Lk), dtype=jnp.int32)
    else:
        # TODO(synk): only key-padding masks (B, Lk)/(B,1,Lk)/(B,1,1,Lk) are
        # supported in-kernel; a general (B, Lq, Lk) mask would need its own
        # blocked input.
        pad = jnp.asarray(pad_attn_mask).astype(jnp.int32).reshape(B, 1, Lk)

    block_q = _pick_block(Lq, block_q_target, lane_multiple=8)
    block_k = _pick_block(Lk, block_k_target, lane_multiple=128)
    nq = Lq // block_q
    nk = Lk // block_k

    # MQA-shared K / V projections computed exactly once (not per q-block,
    # not per head).  Flash loop then streams the narrow (d_k / d_v wide)
    # projected tensors instead of d_model-wide raw K / V.
    k_proj, v_proj = _project_kv(K, V, wk, wv, block_k=block_k)

    kernel = functools.partial(_mqa_flash_kernel,
                               num_heads=num_heads, causal=causal)

    return pl.pallas_call(
        kernel,
        out_shape=jax.ShapeDtypeStruct((B, Lq, d_model), Q.dtype),
        grid_spec=pltpu.PrefetchScalarGridSpec(
            num_scalar_prefetch=0,
            grid=(B, nq, nk),
            in_specs=[
                pl.BlockSpec((1, block_q, d_model), lambda b, qi, ki: (b, qi, 0)),
                pl.BlockSpec((1, block_k, d_k), lambda b, qi, ki: (b, ki, 0)),
                pl.BlockSpec((1, block_k, d_v), lambda b, qi, ki: (b, ki, 0)),
                pl.BlockSpec((1, 1, block_k), lambda b, qi, ki: (b, 0, ki)),
                pl.BlockSpec((d_model, num_heads * d_k), lambda b, qi, ki: (0, 0)),
                pl.BlockSpec((num_heads * d_v, d_model), lambda b, qi, ki: (0, 0)),
            ],
            out_specs=pl.BlockSpec((1, block_q, d_model),
                                   lambda b, qi, ki: (b, qi, 0)),
            scratch_shapes=[
                pltpu.VMEM((num_heads, block_q, d_k), jnp.float32),  # per-head Q
                pltpu.VMEM((num_heads, block_q, 1), jnp.float32),    # running max
                pltpu.VMEM((num_heads, block_q, 1), jnp.float32),    # running sum
                pltpu.VMEM((num_heads, block_q, d_v), jnp.float32),  # accumulator
            ],
        ),
        compiler_params=pltpu.CompilerParams(
            dimension_semantics=("parallel", "parallel", "arbitrary"),
            # Explicit scoped-VMEM limit: above v5e's 16 MiB default, within
            # v7x's 64 MiB physical budget.  Re-derive tile targets per chip.
            vmem_limit_bytes=32 * 1024 * 1024,
        ),
    )(Q, k_proj, v_proj, pad, wq, wo)


def _reference(Q, K, V, params, *, num_heads, d_k, d_v, causal):
    """Pure-JAX reference mirroring the PyTorch forward."""
    B, Lq, d_model = Q.shape
    Lk = K.shape[1]
    q = (Q @ params["wq"]).reshape(B, Lq, num_heads, d_k).transpose(0, 2, 1, 3)  # (B,H,Lq,dk)
    k = K @ params["wk"]                                                          # (B,Lk,dk)
    v = V @ params["wv"]                                                          # (B,Lk,dv)
    s = jnp.einsum("bhqd,bkd->bhqk", q, k) / math.sqrt(d_k)
    if causal:
        cm = jnp.tril(jnp.ones((Lq, Lk)))
        s = jnp.where(cm[None, None] == 0, -1e9, s)
    a = jax.nn.softmax(s, axis=-1)
    o = jnp.einsum("bhqk,bkd->bhqd", a, v).transpose(0, 2, 1, 3).reshape(
        B, Lq, num_heads * d_v)
    return o @ params["wo"]


if __name__ == "__main__":
    # TODO(synk): attn_scores saving for visualization (self.attn_scores) not exported from the kernel.
    num_heads, d_model, d_k, d_v = 4, 128, 32, 32   # lane-dense: H*d_k = H*d_v = d_model = 128
    B, L = 2, 256
    causal = True

    key = jax.random.PRNGKey(0)
    kq, kk, kv, kwq, kwk, kwv, kwo = jax.random.split(key, 7)

    Q = jax.random.normal(kq, (B, L, d_model), dtype=jnp.float32)
    K = jax.random.normal(kk, (B, L, d_model), dtype=jnp.float32)
    V = jax.random.normal(kv, (B, L, d_model), dtype=jnp.float32)

    # Deterministic parameter init, stored pre-transposed as (in, out).
    def init(k, fan_in, fan_out):
        bound = 1.0 / math.sqrt(fan_in)
        return jax.random.uniform(k, (fan_in, fan_out), jnp.float32, -bound, bound)

    params = {
        "wq": init(kwq, d_model, num_heads * d_k),
        "wk": init(kwk, d_model, d_k),
        "wv": init(kwv, d_model, d_v),
        "wo": init(kwo, num_heads * d_v, d_model),
    }

    out = multi_query_attention(Q, K, V, params,
                                num_heads=num_heads, d_k=d_k, d_v=d_v,
                                causal=causal, pad_attn_mask=None,
                                block_q_target=128, block_k_target=128)
    out = jax.block_until_ready(out)

    ref = _reference(Q, K, V, params, num_heads=num_heads, d_k=d_k, d_v=d_v,
                     causal=causal)
    assert out.shape == (B, L, d_model)
    assert jnp.allclose(out, ref, atol=1e-3, rtol=1e-3), "mismatch vs reference"

    print("KERNEL_OK")
</pallas_src>

<mosaic_0001>
module attributes {stable_mosaic.version = 11 : i64} {
  func.func @_kv_project_kernel(%arg0: i32, %arg1: i32, %arg2: memref<1x128x128xf32, #tpu.memory_space<vmem>>, %arg3: memref<1x128x128xf32, #tpu.memory_space<vmem>>, %arg4: memref<128x32xf32, #tpu.memory_space<vmem>>, %arg5: memref<128x32xf32, #tpu.memory_space<vmem>>, %arg6: memref<1x128x32xf32, #tpu.memory_space<vmem>>, %arg7: memref<1x128x32xf32, #tpu.memory_space<vmem>>) attributes {dimension_semantics = [#tpu.dimension_semantics<parallel>, #tpu.dimension_semantics<parallel>], iteration_bounds = array<i64: 2, 2>, scalar_prefetch = 0 : i64, scratch_operands = 0 : i64, tpu.core_type = #tpu.core_type<tc>, window_params = [{transform_indices = @transform_0, window_bounds = array<i64: 1, 128, 128>}, {transform_indices = @transform_1, window_bounds = array<i64: 1, 128, 128>}, {pipeline_mode = #tpu.pipeline_mode<synchronous>, transform_indices = @transform_2, window_bounds = array<i64: 128, 32>}, {pipeline_mode = #tpu.pipeline_mode<synchronous>, transform_indices = @transform_3, window_bounds = array<i64: 128, 32>}, {transform_indices = @transform_4, window_bounds = array<i64: 1, 128, 32>}, {transform_indices = @transform_5, window_bounds = array<i64: 1, 128, 32>}]} {
    %c0 = arith.constant 0 : index
    %c0_0 = arith.constant 0 : index
    %c0_1 = arith.constant 0 : index
    %0 = vector.load %arg2[%c0, %c0_0, %c0_1] : memref<1x128x128xf32, #tpu.memory_space<vmem>>, vector<1x128x128xf32>
    %1 = vector.shape_cast %0 : vector<1x128x128xf32> to vector<128x128xf32>
    %c0_2 = arith.constant 0 : index
    %c0_3 = arith.constant 0 : index
    %2 = vector.load %arg4[%c0_2, %c0_3] : memref<128x32xf32, #tpu.memory_space<vmem>>, vector<128x32xf32>
    %cst = arith.constant dense<0.000000e+00> : vector<128x32xf32>
    %3 = tpu.matmul %1, %2, %cst {dimension_numbers = #tpu.dot_dimension_numbers<[1], [0], [0], [1], [0, 0, 1, 1], [], []>} : vector<128x128xf32>, vector<128x32xf32>, vector<128x32xf32> -> vector<128x32xf32>
    %c0_4 = arith.constant 0 : index
    %c0_5 = arith.constant 0 : index
    %c0_6 = arith.constant 0 : index
    %4 = vector.load %arg6[%c0_4, %c0_5, %c0_6] : memref<1x128x32xf32, #tpu.memory_space<vmem>>, vector<1x128x32xf32>
    %5 = vector.shape_cast %4 : vector<1x128x32xf32> to vector<128x32xf32>
    %6 = vector.shape_cast %3 : vector<128x32xf32> to vector<1x128x32xf32>
    tpu.vector_store %arg6[%c0_4, %c0_5, %c0_6], %6 {strides = array<i32>} : memref<1x128x32xf32, #tpu.memory_space<vmem>>, vector<1x128x32xf32>,
    %c0_7 = arith.constant 0 : index
    %c0_8 = arith.constant 0 : index
    %c0_9 = arith.constant 0 : index
    %7 = vector.load %arg3[%c0_7, %c0_8, %c0_9] : memref<1x128x128xf32, #tpu.memory_space<vmem>>, vector<1x128x128xf32>
    %8 = vector.shape_cast %7 : vector<1x128x128xf32> to vector<128x128xf32>
    %c0_10 = arith.constant 0 : index
    %c0_11 = arith.constant 0 : index
    %9 = vector.load %arg5[%c0_10, %c0_11] : memref<128x32xf32, #tpu.memory_space<vmem>>, vector<128x32xf32>
    %cst_12 = arith.constant dense<0.000000e+00> : vector<128x32xf32>
    %10 = tpu.matmul %8, %9, %cst_12 {dimension_numbers = #tpu.dot_dimension_numbers<[1], [0], [0], [1], [0, 0, 1, 1], [], []>} : vector<128x128xf32>, vector<128x32xf32>, vector<128x32xf32> -> vector<128x32xf32>
    %c0_13 = arith.constant 0 : index
    %c0_14 = arith.constant 0 : index
    %c0_15 = arith.constant 0 : index
    %11 = vector.load %arg7[%c0_13, %c0_14, %c0_15] : memref<1x128x32xf32, #tpu.memory_space<vmem>>, vector<1x128x32xf32>
    %12 = vector.shape_cast %11 : vector<1x128x32xf32> to vector<128x32xf32>
    %13 = vector.shape_cast %10 : vector<128x32xf32> to vector<1x128x32xf32>
    tpu.vector_store %arg7[%c0_13, %c0_14, %c0_15], %13 {strides = array<i32>} : memref<1x128x32xf32, #tpu.memory_space<vmem>>, vector<1x128x32xf32>,
    return
  }
  func.func @transform_0(%arg0: i32, %arg1: i32) -> (i32, i32, i32) {
    %c0_i32 = arith.constant 0 : i32
    %c0_i32_0 = arith.constant 0 : i32
    return %arg0, %arg1, %c0_i32 : i32, i32, i32
  }
  func.func @transform_1(%arg0: i32, %arg1: i32) -> (i32, i32, i32) {
    %c0_i32 = arith.constant 0 : i32
    %c0_i32_0 = arith.constant 0 : i32
    return %arg0, %arg1, %c0_i32 : i32, i32, i32
  }
  func.func @transform_2(%arg0: i32, %arg1: i32) -> (i32, i32) {
    %c0_i32 = arith.constant 0 : i32
    %c0_i32_0 = arith.constant 0 : i32
    %c0_i32_1 = arith.constant 0 : i32
    return %c0_i32, %c0_i32_0 : i32, i32
  }
  func.func @transform_3(%arg0: i32, %arg1: i32) -> (i32, i32) {
    %c0_i32 = arith.constant 0 : i32
    %c0_i32_0 = arith.constant 0 : i32
    %c0_i32_1 = arith.constant 0 : i32
    return %c0_i32, %c0_i32_0 : i32, i32
  }
  func.func @transform_4(%arg0: i32, %arg1: i32) -> (i32, i32, i32) {
    %c0_i32 = arith.constant 0 : i32
    %c0_i32_0 = arith.constant 0 : i32
    return %arg0, %arg1, %c0_i32 : i32, i32, i32
  }
  func.func @transform_5(%arg0: i32, %arg1: i32) -> (i32, i32, i32) {
    %c0_i32 = arith.constant 0 : i32
    %c0_i32_0 = arith.constant 0 : i32
    return %arg0, %arg1, %c0_i32 : i32, i32, i32
  }
}

</mosaic_0001>

<bundles_post_ra>
// kernel: tpu_custom_call.1
= control target key start
LH: loop header
LB: loop body
LE: loop exit
PB: predicated region body
PF: predicated region fallthrough
CT: control target
= control target key end

     0   :  { %s1828_s0 = inlined_call_operand.hbm [shape: f32[2,256,128], index: 0, kind: input, shape index: {}]   ;;  %s1829_s1 = inlined_call_operand.hbm [shape: f32[2,256,128], index: 1, kind: input, shape index: {}]   ;;  %s1830_s2 = inlined_call_operand.vmem [shape: f32[128,32], index: 2, kind: input, shape index: {}]   ;;  %s1831_s3 = inlined_call_operand.vmem [shape: f32[128,32], index: 3, kind: input, shape index: {}]   ;;  %s1832_s4 = inlined_call_operand.vmem [shape: f32[2,256,32], index: 4, kind: output, shape index: {0}]   ;;  %s1833_s5 = inlined_call_operand.vmem [shape: f32[2,256,32], index: 5, kind: output, shape index: {1}]  }
   0x1   :  { %1837 = sst [smem:[#allocation9_spill]] %s1828_s0 }
   0x2   :  { %11 = vsyncpa [#allocation3], 0 }
   0x3   :  { %13 = vsyncpa [#allocation3 + $0x1], 0 }
   0x4   :  { %14 = vsyncpa [#allocation5], 0 }
   0x5   :  { %16 = vsyncpa [#allocation5 + $0x1], 0  ;;  %s1410_s18 = smov 0   ;;  %s1412_s19 = smov 0  }
   0x6   :  { %s1414_s20 = smov 0   ;;  %s1416_s21 = smov 0  }
   0x7   :  { %s1418_s22 = smov 0   ;;  %s1420_s23 = smov 0  }
   0x8   :  { %s1422_s24 = smov 0   ;;  %s1424_s25 = smov 0  }
   0x9 LB: > { %s903_s26 = sadd.s32 4294967295, %s1374_s25   ;;  %s31_s27 = sadd.s32 1, %s1366_s23  ;;  %s1374_s25 = sphi %s1424_s25, %s22_s25   ;;  %s1370_s24 = sphi %s1422_s24, %s1854_s24   ;;  %s1366_s23 = sphi %s1420_s23, %s1853_s23   ;;  %s1362_s22 = sphi %s1418_s22, %s1852_s22   ;;  %s1358_s21 = sphi %s1416_s21, %s1851_s21   ;;  %s1354_s20 = sphi %s1414_s20, %s1850_s20   ;;  %s1350_s19 = sphi %s1412_s19, %s1849_s19   ;;  %s1346_s18 = sphi %s1410_s18, %s1848_s18  }
   0xa   : > { %p32_p0 = scmp.ge.s32.totalorder %s31_s27, 2  ;;  %s34_s28 = sadd.s32 1, %s1370_s24 }
   0xb   : > { %s43_s29 = sadd.s32 1, %s1354_s20  ;;  %p50_p1 = scmp.ne.s32.totalorder %s1354_s20, %s1350_s19 }
   0xc   : > { %s1856_s27 = smov (%p32_p0, %s31_s27), 0  ;;  %s1858_s28 = smov (!%p32_p0, %s34_s28), %s1370_s24 }
   0xd   : > { %s39_s30 = ssub.s32 %s1366_s23, %s1856_s27  ;;  %p51_p2 = scmp.eq.s32.totalorder %s1374_s25, 0 }
   0xe   : > { %p36_p3 = scmp.ge.s32.totalorder %s1858_s28, 2  ;;  %p56_p4 = scmp.ne.s32.totalorder %s1350_s19, %s1346_s18 }
   0xf   : > { %p1461_p5 = por %p51_p2, %p50_p1  ;;  %p57_p6 = scmp.eq.s32.totalorder %s903_s26, 0 }
  0x10   : > { %s1860_s28 = smov (%p36_p3, %s1858_s28), 0  ;;  %p1177_p8 = scmp.lt.s32.totalorder %s1374_s25, 4 }
  0x11   : > { %1839 = sst [smem:[#allocation8_spill]] %s1860_s28  ;;  %p1467_p7 = por %p57_p6, %p56_p4 }
  0x12   : > { %s38_s8 = ssub.s32 %s1370_s24, %s1860_s28  ;;  %s1475_s10 = sand.u32 1, %s1354_s20  }
  0x13   : > { %s1840_s7 = scalar_select %p1467_p7, 1, 0 }
  0x14   : > { %s40_s9 = sor.u32 %s39_s30, %s38_s8  ;;  %s1834_s11 = sshll.u32 %s1475_s10, 7 }
  0x15   : > { %p41_p9 = scmp.eq.s32.totalorder %s40_s9, 0  ;;  %s908_s12 = sshll.u32 %s1366_s23, 4 }
  0x16   : > { %s909_s14 = sshll.u32 %s1370_s24, 5  ;;  %s216_s16 = scalar_lea.vmem [#allocation2], %s1834_s11 }
  0x17   : > { %s1480_s13 = scalar_select %p41_p9, %s1354_s20, %s43_s29  }
  0x18   : > { %s1483_s15 = sadd.s32 %s909_s14, %s908_s12  ;;  %s225_s17 = sshll.u32 %s216_s16, 4  ;;  %s1488_s17 = int_to_ptr.vmem [resolvable:$true] %s225_s17 }
  0x19   : > { %s910_s18 = sshll.u32 %s1483_s15, 7  ;;  %s1841_s0 = sld [smem:[#allocation9_spill]] }
  0x1a   : > { %p1501_p10 = pnand %p1177_p8, %p1461_p5  ;;  %s213_s9 = scalar_lea.sflag [#allocation3], %s1475_s10 }
  0x1c   : > { %p1246_p13 = pneg %p1501_p10 }
  0x1f   : > { %s1495_s8 = scalar_lea.hbm %s1841_s0, %s910_s18  ;;  %s1249_s16 = scalar_lea.hbm %s1841_s0, 8192 }
  0x20   : > { %s1244_s12 = scalar_lea.hbm %s1495_s8, 2048  ;;  %p1250_p2 = scmp.lt.u32.totalorder %s1495_s8, %s1841_s0 }
  0x21   : > { %p1245_p12 = scmp.ne.s32.totalorder %s1495_s8, %s1244_s12  ;;  %p1251_p3 = scmp.lt.u32.totalorder %s1249_s16, %s1244_s12 }
  0x22   : > { %p1253_p5 = scmp.lt.u32.totalorder %s1244_s12, %s1495_s8 }
  0x23   : > { %p1247_p0 = pnand %p1246_p13, %p1245_p12  ;;  %p1252_p4 = por %p1251_p3, %p1250_p2 }
  0x25   : > { %p1248_p1 = pneg %p1247_p0  ;;  %p1254_p6 = por %p1253_p5, %p1252_p4 }
  0x27   : > { %p1255_p8 = pnand %p1254_p6, %p1248_p1 }
  0x29   : > { %1258 = shalt.err (!%p1255_p8)
}
  0x2a   : > { %s1259_s11 = scalar_lea.vmem %s1488_s17, 2048  ;;  %s1376_s6 = smov [#allocation2]  }
  0x2b   : > { %p1260_p9 = scmp.ne.s32.totalorder %s1488_s17, %s1259_s11  ;;  %s1264_s14 = sshll.u32 %s1376_s6, 4  ;;  %s1265_s14 = int_to_ptr.vmem [resolvable:$false] %s1264_s14 }
  0x2c   : > { %s1266_s26 = scalar_lea.vmem %s1265_s14, 4096  ;;  %p1267_p11 = scmp.lt.s32.totalorder %s1488_s17, %s1265_s14 }
  0x2d   : > { %p1262_p12 = pnand %p1260_p9, %p1246_p13  ;;  %p1268_p2 = scmp.lt.s32.totalorder %s1266_s26, %s1259_s11 }
  0x2f   : > { %p1263_p0 = pneg %p1262_p12  ;;  %p1269_p3 = por %p1268_p2, %p1267_p11 }
  0x31   : > { %p1270_p4 = pnand %p1269_p3, %p1263_p0 }
  0x33   : > { %1273 = shalt.err (!%p1270_p4)
}
  0x34   : > { %s1377_s12 = smov 128   ;;  %s1378_s16 = smov 8  }
  0x35   : > { %1173 = dma.hbm_to_vmem [thread:$0]  (!%p1501_p10), %s1495_s8, 2048, %s1488_s17, %s213_s9, %s1377_s12, %s1377_s12, %s1378_s16  }
  0x36   : > { %p256_p11 = scmp.lt.s32.totalorder %s1374_s25, 5  ;;  %s1543_s6 = scalar_lea.hbm %s1829_s1, %s910_s18 }
  0x37   : > { %p1843_p1 = scmp.ge.s32.totalorder %s1374_s25, 1  ;;  %s1845_s26 = sshll.u32 %s1475_s10, 7 }
  0x38   : > { %s239_s0 = scalar_lea.vmem [#allocation4], %s1845_s26  ;;  %s236_s15 = scalar_lea.sflag [#allocation5], %s1475_s10 }
  0x39   : > { %p1547_p5 = pnand %p1843_p1, %p256_p11  ;;  %s248_s28 = sshll.u32 %s239_s0, 4  ;;  %s1553_s28 = int_to_ptr.vmem [resolvable:$true] %s248_s28 }
  0x3a   : > { %s1274_s17 = scalar_lea.hbm %s1543_s6, 2048  ;;  %s1279_s9 = scalar_lea.hbm %s1829_s1, 8192 }
  0x3b   : > { %p1275_p6 = scmp.ne.s32.totalorder %s1543_s6, %s1274_s17  ;;  %p1280_p12 = scmp.lt.u32.totalorder %s1543_s6, %s1829_s1 }
  0x3c   : > { %p1281_p0 = scmp.lt.u32.totalorder %s1279_s9, %s1274_s17  ;;  %p1283_p3 = scmp.lt.u32.totalorder %s1274_s17, %s1543_s6 }
  0x3d   : > { %p1277_p8 = pnand %p1275_p6, %p1246_p13 }
  0x3e   : > { %p1282_p2 = por %p1281_p0, %p1280_p12 }
  0x3f   : > { %p1278_p9 = pneg %p1277_p8 }
  0x40   : > { %p1284_p4 = por %p1283_p3, %p1282_p2 }
  0x42   : > { %p1285_p11 = pnand %p1284_p4, %p1278_p9 }
  0x44   : > { %1288 = shalt.err (!%p1285_p11)
}
  0x45   : > { %s1289_s0 = scalar_lea.vmem %s1553_s28, 2048  ;;  %s1379_s26 = smov [#allocation4]  }
  0x46   : > { %p1290_p1 = scmp.ne.s32.totalorder %s1553_s28, %s1289_s0  ;;  %s1294_s18 = sshll.u32 %s1379_s26, 4  ;;  %s1295_s18 = int_to_ptr.vmem [resolvable:$false] %s1294_s18 }
  0x47   : > { %s1296_s8 = scalar_lea.vmem %s1295_s18, 4096  ;;  %p1297_p7 = scmp.lt.s32.totalorder %s1553_s28, %s1295_s18 }
  0x48   : > { %p1292_p6 = pnand %p1290_p1, %p1246_p13  ;;  %p1298_p12 = scmp.lt.s32.totalorder %s1296_s8, %s1289_s0 }
  0x4a   : > { %p1293_p8 = pneg %p1292_p6  ;;  %p1299_p0 = por %p1298_p12, %p1297_p7 }
  0x4c   : > { %p1300_p2 = pnand %p1299_p0, %p1293_p8 }
  0x4e   : > { %1303 = shalt.err (!%p1300_p2)
}
  0x4f   : > { %1176 = dma.hbm_to_vmem [thread:$0]  (!%p1501_p10), %s1543_s6, 2048, %s1553_s28, %s236_s15, %s1377_s12, %s1377_s12, %s1378_s16  }
  0x50   : > { %260 = sbr.rel (%p1547_p5) target bundleno = 368 (0x170), region = 36  ;;  %s262_s17 = sand.u32 (!%p1547_p5), 1, %s1350_s19  }
  0x51   : > { %s916_s9 = sshll.u32 (!%p1547_p5), %s262_s17, 7  ;;  %s263_s11 = scalar_lea.sflag (!%p1547_p5), [#allocation3], %s262_s17 }
  0x52   : > { %s1587_s30 = scalar_lea.vmem (!%p1547_p5), [#allocation2], %s916_s9  ;;  %p1846_p7 = scmp.ne.s32.totalorder (!%p1547_p5), %s1840_s7, 0 }
  0x57   : > { %1337 = dma.done.wait (%p1846_p7), %s263_s11, 2048  }
  0x58   : > { %1339 = vsyncadd (%p1846_p7), %s263_s11, 4294965248  ;;  %s272_s10 = scalar_lea.sflag [#allocation5], %s262_s17  ;;  %s1593_s29 = scalar_lea.vmem [#allocation4], %s916_s9 }
  0x59   : > { %1341 = dma.done.wait (%p1846_p7), %s272_s10, 2048  }
  0x5a   : > { %1343 = vsyncadd (%p1846_p7), %s272_s10, 4294965248  ;;  %v358_v0 = vld [vmem:[%s1830_s2] sm:$0xff]  ;;  %v359_v1 = vld [vmem:[%s1830_s2 + $0x8] sm:$0xff]  ;;  %s918_s14 = sshll.u32 %s1358_s21, 4  ;;  %p323_p10 = scmp.lt.s32.totalorder %s1362_s22, 1  ;;  %vm519_vm0 = vcmask 261120  }
  0x5b   : > { %v552_v2 = vld [vmem:[%s1831_s3] sm:$0xff]  ;;  %v1102_v3 = vpack.c.bf16 %v359_v1, %v358_v0  ;;  %v553_v4 = vld [vmem:[%s1831_s3 + $0x8] sm:$0xff]  ;;  %v360_v5 = vld [vmem:[%s1830_s2 + $0x10] sm:$0xff]  ;;  %p325_p13 = scmp.lt.s32.totalorder %s918_s14, 31 }
  0x5c   : > { %v361_v6 = vld [vmem:[%s1830_s2 + $0x18] sm:$0xff]  ;;  %v1134_v7 = vpack.c.bf16 %v553_v4, %v552_v2  ;;  %v554_v9 = vld [vmem:[%s1831_s3 + $0x10] sm:$0xff]  ;;  %v362_v11 = vld [vmem:[%s1830_s2 + $0x20] sm:$0xff]  ;;  %s1862_s22 = smov (!%p323_p10, %s1362_s22), 1 }
  0x5d   : > { %v1106_v8 = vpack.c.bf16 %v361_v6, %v360_v5  ;;  %v555_v10 = vld [vmem:[%s1831_s3 + $0x18] sm:$0xff]  ;;  %1103 = vmatprep.subr.bf16.mxu0 %v1102_v3  ;;  %v363_v13 = vld [vmem:[%s1830_s2 + $0x28] sm:$0xff]  ;;  %v556_v14 = vld [vmem:[%s1831_s3 + $0x20] sm:$0xff]  ;;  %s1864_s14 = smov (!%p325_p13, %s918_s14), 31  ;;  %s919_s15 = sshll.u32 %s1862_s22, 5 }
  0x5e   : > { %v1138_v12 = vpack.c.bf16 %v555_v10, %v554_v9  ;;  %v557_v15 = vld [vmem:[%s1831_s3 + $0x28] sm:$0xff]  ;;  %1135 = vmatprep.subr.bf16.mxu1 %v1134_v7  ;;  %1105 = vmatpush3.bf16.msra.mxu0 %v1102_v3  ;;  %v1110_v16 = vpack.c.bf16 %v363_v13, %v362_v11  ;;  %v364_v18 = vld [vmem:[%s1830_s2 + $0x30] sm:$0xff]  ;;  %v365_v19 = vld [vmem:[%s1830_s2 + $0x38] sm:$0xff]  ;;  %s328_s0 = sadd.s32 %s919_s15, %s1864_s14 }
  0x5f   : > { %1137 = vmatpush3.bf16.msra.mxu1 %v1134_v7  ;;  %1107 = vmatprep.subr.bf16.mxu0 %v1106_v8  ;;  %v1142_v17 = vpack.c.bf16 %v557_v15, %v556_v14  ;;  %v558_v20 = vld [vmem:[%s1831_s3 + $0x30] sm:$0xff]  ;;  %v559_v21 = vld [vmem:[%s1831_s3 + $0x38] sm:$0xff]  ;;  %v1114_v22 = vpack.c.bf16 %v365_v19, %v364_v18  ;;  %v366_v24 = vld [vmem:[%s1830_s2 + $0x40] sm:$0xff]  ;;  %s920_s26 = sshll.u32 %s328_s0, 3 }
  0x60   : > { %1139 = vmatprep.subr.bf16.mxu1 %v1138_v12  ;;  %v1146_v23 = vpack.c.bf16 %v559_v21, %v558_v20  ;;  %v367_v25 = vld [vmem:[%s1830_s2 + $0x48] sm:$0xff]  ;;  %v342_v26 = vld [vmem:[%s1587_s30] sm:$0xff]  ;;  %v368_v32 = vld [vmem:[%s1830_s2 + $0x50] sm:$0xff]  ;;  %s1733_s8 = scalar_lea.vmem %s1832_s4, %s920_s26  ;;  %s1738_s21 = scalar_lea.vmem %s1833_s5, %s920_s26 }
  0x61   : > { %v560_v27 = vld [vmem:[%s1831_s3 + $0x40] sm:$0xff]  ;;  %v561_v28 = vld [vmem:[%s1831_s3 + $0x48] sm:$0xff]  ;;  %1022 = vmatprep.mubr.f32.mxu0 %v342_v26  ;;  %v1118_v30 = vpack.c.bf16 %v367_v25, %v366_v24  ;;  %v369_v33 = vld [vmem:[%s1830_s2 + $0x58] sm:$0xff] }
  0x62   : > { %1109 = vmatpush3.bf16.msra.mxu0 %v1106_v8  ;;  %v536_v29 = vld [vmem:[%s1593_s29] sm:$0xff]  ;;  %v1150_v31 = vpack.c.bf16 %v561_v28, %v560_v27  ;;  %v562_v34 = vld [vmem:[%s1831_s3 + $0x50] sm:$0xff]  ;;  %v563_v35 = vld [vmem:[%s1831_s3 + $0x58] sm:$0xff]  ;;  %v1122_v36 = vpack.c.bf16 %v369_v33, %v368_v32 }
  0x63   : > { %1141 = vmatpush3.bf16.msra.mxu1 %v1138_v12  ;;  %1111 = vmatprep.subr.bf16.mxu0 %v1110_v16  ;;  %v1154_v37 = vpack.c.bf16 %v563_v35, %v562_v34  ;;  %v370_v38 = vld [vmem:[%s1830_s2 + $0x60] sm:$0xff]  ;;  %v371_v39 = vld [vmem:[%s1830_s2 + $0x68] sm:$0xff]  ;;  %v372_v44 = vld [vmem:[%s1830_s2 + $0x70] sm:$0xff] }
  0x64   : > { %1143 = vmatprep.subr.bf16.mxu1 %v1142_v17  ;;  %1078 = vmatprep.mubr.f32.mxu1 %v536_v29  ;;  %v564_v40 = vld [vmem:[%s1831_s3 + $0x60] sm:$0xff]  ;;  %v565_v41 = vld [vmem:[%s1831_s3 + $0x68] sm:$0xff]  ;;  %v1126_v42 = vpack.c.bf16 %v371_v39, %v370_v38  ;;  %v373_v45 = vld [vmem:[%s1830_s2 + $0x78] sm:$0xff] }
  0x65   : > { %v1158_v43 = vpack.c.bf16 %v565_v41, %v564_v40  ;;  %v566_v46 = vld [vmem:[%s1831_s3 + $0x70] sm:$0xff]  ;;  %v567_v47 = vld [vmem:[%s1831_s3 + $0x78] sm:$0xff]  ;;  %v1130_v48 = vpack.c.bf16 %v373_v45, %v372_v44  ;;  %v343_v50 = vld [vmem:[%s1587_s30 + $0x8] sm:$0xff] }
  0x66   : > { %1113 = vmatpush3.bf16.msra.mxu0 %v1110_v16  ;;  %v1162_v49 = vpack.c.bf16 %v567_v47, %v566_v46  ;;  %v537_v51 = vld [vmem:[%s1593_s29 + $0x8] sm:$0xff]  ;;  %v344_v52 = vld [vmem:[%s1587_s30 + $0x10] sm:$0xff]  ;;  %v345_v54 = vld [vmem:[%s1587_s30 + $0x18] sm:$0xff] }
  0x67   : > { %1145 = vmatpush3.bf16.msra.mxu1 %v1142_v17  ;;  %1115 = vmatprep.subr.bf16.mxu0 %v1114_v22  ;;  %v538_v53 = vld [vmem:[%s1593_s29 + $0x10] sm:$0xff]  ;;  %v539_v55 = vld [vmem:[%s1593_s29 + $0x18] sm:$0xff]  ;;  %v346_v56 = vld [vmem:[%s1587_s30 + $0x20] sm:$0xff] }
  0x68   : > { %1147 = vmatprep.subr.bf16.mxu1 %v1146_v23  ;;  %v540_v57 = vld [vmem:[%s1593_s29 + $0x20] sm:$0xff]  ;;  %v347_v58 = vld [vmem:[%s1587_s30 + $0x28] sm:$0xff]  ;;  %v348_v60 = vld [vmem:[%s1587_s30 + $0x30] sm:$0xff] }
  0x69   : > { %v541_v59 = vld [vmem:[%s1593_s29 + $0x28] sm:$0xff]  ;;  %v542_v61 = vld [vmem:[%s1593_s29 + $0x30] sm:$0xff]  ;;  %v349_v62 = vld [vmem:[%s1587_s30 + $0x38] sm:$0xff] }
  0x6a   : > { %1117 = vmatpush3.bf16.msra.mxu0 %v1114_v22  ;;  %v543_v63 = vld [vmem:[%s1593_s29 + $0x38] sm:$0xff]  ;;  %v350_v0 = vld [vmem:[%s1587_s30 + $0x40] sm:$0xff]  ;;  %v351_v2 = vld [vmem:[%s1587_s30 + $0x48] sm:$0xff] }
  0x6b   : > { %1149 = vmatpush3.bf16.msra.mxu1 %v1146_v23  ;;  %1119 = vmatprep.subr.bf16.mxu0 %v1118_v30  ;;  %v544_v1 = vld [vmem:[%s1593_s29 + $0x40] sm:$0xff]  ;;  %v545_v3 = vld [vmem:[%s1593_s29 + $0x48] sm:$0xff]  ;;  %v352_v4 = vld [vmem:[%s1587_s30 + $0x50] sm:$0xff] }
  0x6c   : > { %1151 = vmatprep.subr.bf16.mxu1 %v1150_v31  ;;  %v546_v5 = vld [vmem:[%s1593_s29 + $0x50] sm:$0xff]  ;;  %v353_v6 = vld [vmem:[%s1587_s30 + $0x58] sm:$0xff]  ;;  %v354_v8 = vld [vmem:[%s1587_s30 + $0x60] sm:$0xff] }
  0x6d   : > { %v547_v7 = vld [vmem:[%s1593_s29 + $0x58] sm:$0xff]  ;;  %v548_v9 = vld [vmem:[%s1593_s29 + $0x60] sm:$0xff]  ;;  %v355_v10 = vld [vmem:[%s1587_s30 + $0x68] sm:$0xff] }
  0x6e   : > { %1121 = vmatpush3.bf16.msra.mxu0 %v1118_v30  ;;  %v549_v11 = vld [vmem:[%s1593_s29 + $0x68] sm:$0xff]  ;;  %v356_v12 = vld [vmem:[%s1587_s30 + $0x70] sm:$0xff]  ;;  %v357_v14 = vld [vmem:[%s1587_s30 + $0x78] sm:$0xff] }
  0x6f   : > { %1153 = vmatpush3.bf16.msra.mxu1 %v1150_v31  ;;  %1123 = vmatprep.subr.bf16.mxu0 %v1122_v36  ;;  %v550_v13 = vld [vmem:[%s1593_s29 + $0x70] sm:$0xff]  ;;  %v551_v15 = vld [vmem:[%s1593_s29 + $0x78] sm:$0xff] }
  0x70   : > { %1155 = vmatprep.subr.bf16.mxu1 %v1154_v37 }
  0x72   : > { %1125 = vmatpush3.bf16.msra.mxu0 %v1122_v36 }
  0x73   : > { %1157 = vmatpush3.bf16.msra.mxu1 %v1154_v37  ;;  %1127 = vmatprep.subr.bf16.mxu0 %v1126_v42 }
  0x74   : > { %1159 = vmatprep.subr.bf16.mxu1 %v1158_v43 }
  0x76   : > { %1129 = vmatpush3.bf16.msra.mxu0 %v1126_v42 }
  0x77   : > { %1161 = vmatpush3.bf16.msra.mxu1 %v1158_v43  ;;  %1131 = vmatprep.subr.bf16.mxu0 %v1130_v48 }
  0x78   : > { %1163 = vmatprep.subr.bf16.mxu1 %v1162_v49 }
  0x7a   : > { %1133 = vmatpush3.bf16.msra.mxu0 %v1130_v48 }
  0x7b   : > { %1165 = vmatpush3.bf16.msra.mxu1 %v1162_v49 }
  0x7d   : > { %1023 = vmatmul.mubr.f32.vlgmr.msra.gmra.mrb[0].mxu0 %v343_v50 }
  0x7e   : > { %1079 = vmatmul.mubr.f32.vlgmr.msra.gmra.mrb[0].mxu1 %v537_v51  ;;  %1025 = vmatprep.mubr.f32.mxu0 %v344_v52 }
  0x7f   : > { %1081 = vmatprep.mubr.f32.mxu1 %v538_v53 }
  0x81   : > { %1026 = vmatmul.mubr.f32.gmra.mrb[2].mxu0 %v345_v54 }
  0x82   : > { %1082 = vmatmul.mubr.f32.gmra.mrb[2].mxu1 %v539_v55  ;;  %1028 = vmatprep.mubr.f32.mxu0 %v346_v56 }
  0x83   : > { %1084 = vmatprep.mubr.f32.mxu1 %v540_v57 }
  0x85   : > { %1029 = vmatmul.mubr.f32.gmra.mrb[4].mxu0 %v347_v58 }
  0x86   : > { %1085 = vmatmul.mubr.f32.gmra.mrb[4].mxu1 %v541_v59  ;;  %1031 = vmatprep.mubr.f32.mxu0 %v348_v60 }
  0x87   : > { %1087 = vmatprep.mubr.f32.mxu1 %v542_v61 }
  0x89   : > { %1032 = vmatmul.mubr.f32.gmra.mrb[6].mxu0 %v349_v62 }
  0x8a   : > { %1088 = vmatmul.mubr.f32.gmra.mrb[6].mxu1 %v543_v63  ;;  %1034 = vmatprep.mubr.f32.mxu0 %v350_v0 }
  0x8b   : > { %1090 = vmatprep.mubr.f32.mxu1 %v544_v1 }
  0x8d   : > { %1035 = vmatmul.mubr.f32.gmra.mrb[8].mxu0 %v351_v2 }
  0x8e   : > { %1091 = vmatmul.mubr.f32.gmra.mrb[8].mxu1 %v545_v3  ;;  %1037 = vmatprep.mubr.f32.mxu0 %v352_v4 }
  0x8f   : > { %1093 = vmatprep.mubr.f32.mxu1 %v546_v5 }
  0x91   : > { %1038 = vmatmul.mubr.f32.gmra.mrb[10].mxu0 %v353_v6 }
  0x92   : > { %1094 = vmatmul.mubr.f32.gmra.mrb[10].mxu1 %v547_v7  ;;  %1040 = vmatprep.mubr.f32.mxu0 %v354_v8 }
  0x93   : > { %1096 = vmatprep.mubr.f32.mxu1 %v548_v9 }
  0x95   : > { %1041 = vmatmul.mubr.f32.gmra.mrb[12].mxu0 %v355_v10 }
  0x96   : > { %1097 = vmatmul.mubr.f32.gmra.mrb[12].mxu1 %v549_v11  ;;  %1043 = vmatprep.mubr.f32.mxu0 %v356_v12 }
  0x97   : > { %1099 = vmatprep.mubr.f32.mxu1 %v550_v13 }
  0x99   : > { %1044 = vmatmul.mubr.f32.gmra.mrb[14].mxu0 %v357_v14 }
  0x9a   : > { %1100 = vmatmul.mubr.f32.gmra.mrb[14].mxu1 %v551_v15 }
 0x150   : > { %v1024_v16 = vpop.f32.mrb[0].mxu0 }
 0x151   : > { %521 = vst.msk [vmem:[%s1733_s8 + $0x8] sm:$0xff] %vm519_vm0, %v1024_v16  ;;  %v1080_v17 = vpop.f32.mrb[0].mxu1  ;;  %v440_v18 = vpop.f32.mrb[1].mxu0 }
 0x152   : > { %714 = vst.msk [vmem:[%s1738_s21 + $0x8] sm:$0xff] %vm519_vm0, %v1080_v17  ;;  %520 = vst.msk [vmem:[%s1733_s8] sm:$0xff] %vm519_vm0, %v440_v18  ;;  %v634_v19 = vpop.f32.mrb[1].mxu1 }
 0x153   : > { %713 = vst.msk [vmem:[%s1738_s21] sm:$0xff] %vm519_vm0, %v634_v19 }
 0x154   : > { %v1027_v20 = vpop.f32.mrb[2].mxu0 }
 0x155   : > { %523 = vst.msk [vmem:[%s1733_s8 + $0x18] sm:$0xff] %vm519_vm0, %v1027_v20  ;;  %v1083_v21 = vpop.f32.mrb[2].mxu1  ;;  %v450_v22 = vpop.f32.mrb[3].mxu0 }
 0x156   : > { %716 = vst.msk [vmem:[%s1738_s21 + $0x18] sm:$0xff] %vm519_vm0, %v1083_v21  ;;  %522 = vst.msk [vmem:[%s1733_s8 + $0x10] sm:$0xff] %vm519_vm0, %v450_v22  ;;  %v644_v23 = vpop.f32.mrb[3].mxu1 }
 0x157   : > { %715 = vst.msk [vmem:[%s1738_s21 + $0x10] sm:$0xff] %vm519_vm0, %v644_v23 }
 0x158   : > { %v1030_v24 = vpop.f32.mrb[4].mxu0 }
 0x159   : > { %525 = vst.msk [vmem:[%s1733_s8 + $0x28] sm:$0xff] %vm519_vm0, %v1030_v24  ;;  %v1086_v25 = vpop.f32.mrb[4].mxu1  ;;  %v460_v26 = vpop.f32.mrb[5].mxu0 }
 0x15a   : > { %718 = vst.msk [vmem:[%s1738_s21 + $0x28] sm:$0xff] %vm519_vm0, %v1086_v25  ;;  %524 = vst.msk [vmem:[%s1733_s8 + $0x20] sm:$0xff] %vm519_vm0, %v460_v26  ;;  %v654_v27 = vpop.f32.mrb[5].mxu1 }
 0x15b   : > { %717 = vst.msk [vmem:[%s1738_s21 + $0x20] sm:$0xff] %vm519_vm0, %v654_v27 }
 0x15c   : > { %v1033_v28 = vpop.f32.mrb[6].mxu0 }
 0x15d   : > { %527 = vst.msk [vmem:[%s1733_s8 + $0x38] sm:$0xff] %vm519_vm0, %v1033_v28  ;;  %v1089_v29 = vpop.f32.mrb[6].mxu1  ;;  %v470_v30 = vpop.f32.mrb[7].mxu0 }
 0x15e   : > { %720 = vst.msk [vmem:[%s1738_s21 + $0x38] sm:$0xff] %vm519_vm0, %v1089_v29  ;;  %526 = vst.msk [vmem:[%s1733_s8 + $0x30] sm:$0xff] %vm519_vm0, %v470_v30  ;;  %v664_v31 = vpop.f32.mrb[7].mxu1 }
 0x15f   : > { %719 = vst.msk [vmem:[%s1738_s21 + $0x30] sm:$0xff] %vm519_vm0, %v664_v31 }
 0x160   : > { %v1036_v32 = vpop.f32.mrb[8].mxu0 }
 0x161   : > { %529 = vst.msk [vmem:[%s1733_s8 + $0x48] sm:$0xff] %vm519_vm0, %v1036_v32  ;;  %v1092_v33 = vpop.f32.mrb[8].mxu1  ;;  %v480_v34 = vpop.f32.mrb[9].mxu0 }
 0x162   : > { %722 = vst.msk [vmem:[%s1738_s21 + $0x48] sm:$0xff] %vm519_vm0, %v1092_v33  ;;  %528 = vst.msk [vmem:[%s1733_s8 + $0x40] sm:$0xff] %vm519_vm0, %v480_v34  ;;  %v674_v35 = vpop.f32.mrb[9].mxu1 }
 0x163   : > { %721 = vst.msk [vmem:[%s1738_s21 + $0x40] sm:$0xff] %vm519_vm0, %v674_v35 }
 0x164   : > { %v1039_v36 = vpop.f32.mrb[10].mxu0 }
 0x165   : > { %531 = vst.msk [vmem:[%s1733_s8 + $0x58] sm:$0xff] %vm519_vm0, %v1039_v36  ;;  %v1095_v37 = vpop.f32.mrb[10].mxu1  ;;  %v490_v38 = vpop.f32.mrb[11].mxu0 }
 0x166   : > { %724 = vst.msk [vmem:[%s1738_s21 + $0x58] sm:$0xff] %vm519_vm0, %v1095_v37  ;;  %530 = vst.msk [vmem:[%s1733_s8 + $0x50] sm:$0xff] %vm519_vm0, %v490_v38  ;;  %v684_v39 = vpop.f32.mrb[11].mxu1 }
 0x167   : > { %723 = vst.msk [vmem:[%s1738_s21 + $0x50] sm:$0xff] %vm519_vm0, %v684_v39 }
 0x168   : > { %v1042_v40 = vpop.f32.mrb[12].mxu0 }
 0x169   : > { %533 = vst.msk [vmem:[%s1733_s8 + $0x68] sm:$0xff] %vm519_vm0, %v1042_v40  ;;  %v1098_v41 = vpop.f32.mrb[12].mxu1  ;;  %v500_v42 = vpop.f32.mrb[13].mxu0 }
 0x16a   : > { %726 = vst.msk [vmem:[%s1738_s21 + $0x68] sm:$0xff] %vm519_vm0, %v1098_v41  ;;  %532 = vst.msk [vmem:[%s1733_s8 + $0x60] sm:$0xff] %vm519_vm0, %v500_v42  ;;  %v694_v43 = vpop.f32.mrb[13].mxu1 }
 0x16b   : > { %725 = vst.msk [vmem:[%s1738_s21 + $0x60] sm:$0xff] %vm519_vm0, %v694_v43 }
 0x16c   : > { %v1045_v44 = vpop.f32.mrb[14].mxu0 }
 0x16d   : > { %535 = vst.msk [vmem:[%s1733_s8 + $0x78] sm:$0xff] %vm519_vm0, %v1045_v44  ;;  %v1101_v45 = vpop.f32.mrb[14].mxu1  ;;  %v510_v46 = vpop.f32.mrb[15].mxu0 }
 0x16e   : > { %728 = vst.msk [vmem:[%s1738_s21 + $0x78] sm:$0xff] %vm519_vm0, %v1101_v45  ;;  %534 = vst.msk [vmem:[%s1733_s8 + $0x70] sm:$0xff] %vm519_vm0, %v510_v46  ;;  %v704_v47 = vpop.f32.mrb[15].mxu1 }
 0x16f   : > { %727 = vst.msk [vmem:[%s1738_s21 + $0x70] sm:$0xff] %vm519_vm0, %v704_v47 }
 0x170 PF: > { %s22_s25 = sadd.s32 1, %s1374_s25   ;;  %s1847_s17 = sld [smem:[#allocation8_spill]] }
 0x171   : > { %p19_p5 = scmp.ge.s32.totalorder %s22_s25, 6   ;;  %s1848_s18 = smov %s1350_s19 }
 0x172   : > { %s1849_s19 = smov %s1354_s20  ;;  %s1850_s20 = smov %s1480_s13 }
 0x173   : > { %s1851_s21 = smov %s1366_s23  ;;  %s1852_s22 = smov %s1370_s24 }
 0x174   : > { %s1853_s23 = smov %s1856_s27  ;;  %21 = sbr.rel (!%p19_p5) target bundleno = 9 (0x9), region = 101 }
 0x176   : > { %s1854_s24 = smov %s1847_s17 }
 0x17b   :  { %784 = vsyncpa [#allocation3], 1 }
 0x17c   :  { %786 = vsyncpa [#allocation3 + $0x1], 1 }
 0x17d   :  { %787 = vsyncpa [#allocation5], 1 }
 0x17e   :  { %789 = vsyncpa [#allocation5 + $0x1], 1 }

</bundles_post_ra>
